<compile_context>
chip_gen: v5e
topology: v5e:2x2
jax: 0.10.0
libtpu: 0.0.40
codegen_flags: <defaults>
</compile_context>

<pallas_src>
import functools

import jax
import jax.numpy as jnp
from jax.experimental import pallas as pl
from jax.experimental.pallas import tpu as pltpu


IN_DIM = 80 + 4        # 84 real input features
H1 = H2 = H3 = 128
H4 = 64
N_ACTIONS = 4


def _round_up(n, m):
    return ((n + m - 1) // m) * m


def _policy_kernel(x_ref,
                   w1_ref, b1_ref,
                   w2_ref, b2_ref,
                   w3_ref, b3_ref,
                   w4_ref, b4_ref,
                   w5_ref, b5_ref,
                   out_ref):
    cdt = w1_ref.dtype            # bf16 MXU operands, f32 accumulation

    # Fused input cast; contraction over K=84 (Mosaic pads internally).
    x = x_ref[...].astype(cdt)
    h = jnp.dot(x, w1_ref[...], preferred_element_type=jnp.float32)
    h = jnp.maximum(h + b1_ref[...], 0.0)                      # relu, f32

    h = jnp.dot(h.astype(cdt), w2_ref[...], preferred_element_type=jnp.float32)
    h = jnp.maximum(h + b2_ref[...], 0.0)

    h = jnp.dot(h.astype(cdt), w3_ref[...], preferred_element_type=jnp.float32)
    h = jnp.maximum(h + b3_ref[...], 0.0)

    h = jnp.dot(h.astype(cdt), w4_ref[...], preferred_element_type=jnp.float32)
    h = jnp.maximum(h + b4_ref[...], 0.0)

    # TODO(synk): nn.Dropout(p=0.6) is identity in eval mode; training-mode
    #             stochastic masking (pltpu.prng_random_bits) is not emitted.

    # Action scores, narrow N=4 output (full last dim of the output array).
    s = jnp.dot(h.astype(cdt), w5_ref[...], preferred_element_type=jnp.float32)
    s = s + b5_ref[...]

    # scores - max(scores, dim=1, keepdim=True) followed by softmax.
    m = jnp.max(s, axis=-1, keepdims=True)
    e = jnp.exp(s - m)
    denom = jnp.sum(e, axis=-1, keepdims=True)
    out_ref[...] = e / denom       # exact normalization: rows sum to 1


def prepare_params(params, compute_dtype=jnp.bfloat16):
    """Cast PyTorch-layout params into kernel layout (do this once)."""
    out = []
    for (w, b) in params:
        out.append(w.astype(compute_dtype))
        out.append(b.reshape(1, -1).astype(jnp.float32))
    return tuple(out)


@functools.partial(jax.jit, static_argnames=("tb_max",))
def policy_forward(x, prepped, tb_max=512):
    """x: [B, 84] float32 -> [B, 4] action probabilities (float32)."""
    (w1, b1, w2, b2, w3, b3, w4, b4, w5, b5) = prepped
    B = x.shape[0]

    # Batch tile: big enough to amortize per-grid-step overhead, snapped to
    # the sublane multiple of 8 for tiny RL-rollout batches.
    TB = tb_max if B >= tb_max else _round_up(B, 8)
    B_pad = _round_up(B, TB)
    grid = (pl.cdiv(B_pad, TB),)

    # Only a cheap row-pad (no feature pad, no dtype cast) in the wrapper.
    xp = x.astype(jnp.float32)
    if B_pad != B:
        xp = jnp.pad(xp, ((0, B_pad - B), (0, 0)))

    const = lambda a: pl.BlockSpec(a.shape, lambda i: (0, 0))  # VMEM-resident

    out = pl.pallas_call(
        _policy_kernel,
        out_shape=jax.ShapeDtypeStruct((B_pad, N_ACTIONS), jnp.float32),
        grid=grid,
        in_specs=[pl.BlockSpec((TB, IN_DIM), lambda i: (i, 0)),
                  const(w1), const(b1),
                  const(w2), const(b2),
                  const(w3), const(b3),
                  const(w4), const(b4),
                  const(w5), const(b5)],
        out_specs=pl.BlockSpec((TB, N_ACTIONS), lambda i: (i, 0)),
        compiler_params=pltpu.CompilerParams(
            # On v7x, pltpu.CORE_PARALLEL (with >=2 grid steps) shards batch
            # tiles across both TensorCores; "parallel" kept for portability.
            dimension_semantics=("parallel",)),
    )(xp, w1, b1, w2, b2, w3, b3, w4, b4, w5, b5)

    return out[:B]


def init_params(key):
    """Deterministic PyTorch-Linear-style init (uniform +/- 1/sqrt(fan_in))."""
    dims = [(IN_DIM, H1), (H1, H2), (H2, H3), (H3, H4), (H4, N_ACTIONS)]
    params = []
    for (fan_in, fan_out) in dims:
        key, kw, kb = jax.random.split(key, 3)
        bound = 1.0 / (fan_in ** 0.5)
        w = jax.random.uniform(kw, (fan_in, fan_out), jnp.float32, -bound, bound)
        b = jax.random.uniform(kb, (1, fan_out), jnp.float32, -bound, bound)
        params.append((w, b))
    return params


def reference_forward(x, params):
    h = x
    for (w, b) in params[:-1]:
        h = jnp.maximum(h @ w + b, 0.0)
    w5, b5 = params[-1]
    s = h @ w5 + b5
    s = s - jnp.max(s, axis=1, keepdims=True)
    return jax.nn.softmax(s, axis=-1)


if __name__ == "__main__":
    key = jax.random.PRNGKey(0)
    key, kx1, kx2 = jax.random.split(key, 3)

    params = init_params(key)
    prepped = prepare_params(params)

    # Small RL-rollout sized batch (single tile, TB snapped to 8).
    B1 = 8
    x1 = jax.random.normal(kx1, (B1, IN_DIM), jnp.float32)
    out1 = jax.block_until_ready(policy_forward(x1, prepped))
    ref1 = reference_forward(x1, params)
    assert out1.shape == (B1, N_ACTIONS)
    # bf16 weights/activations => loosened tolerance vs. f32 reference.
    assert bool(jnp.allclose(out1, ref1, atol=2e-2, rtol=2e-2))
    # Exact divide => rows sum to 1 within f32 rounding.
    assert bool(jnp.allclose(jnp.sum(out1, axis=-1), 1.0, atol=1e-4))

    # Larger batch exercising batch padding (and multi-tile when B > tb_max).
    B2 = 200
    x2 = jax.random.normal(kx2, (B2, IN_DIM), jnp.float32)
    out2 = jax.block_until_ready(policy_forward(x2, prepped))
    ref2 = reference_forward(x2, params)
    assert out2.shape == (B2, N_ACTIONS)
    assert bool(jnp.allclose(out2, ref2, atol=2e-2, rtol=2e-2))
    assert bool(jnp.allclose(jnp.sum(out2, axis=-1), 1.0, atol=1e-4))

    # Multi-tile grid path (B > tb_max) with a smaller tile.
    B3 = 1040
    x3 = jax.random.normal(key, (B3, IN_DIM), jnp.float32)
    out3 = jax.block_until_ready(policy_forward(x3, prepped, tb_max=256))
    ref3 = reference_forward(x3, params)
    assert out3.shape == (B3, N_ACTIONS)
    assert bool(jnp.allclose(out3, ref3, atol=2e-2, rtol=2e-2))
    assert bool(jnp.allclose(jnp.sum(out3, axis=-1), 1.0, atol=1e-4))

    print("KERNEL_OK")
</pallas_src>

<mosaic_0001>
module attributes {stable_mosaic.version = 11 : i64} {
  func.func @_policy_kernel(%arg0: i32, %arg1: memref<8x84xf32, #tpu.memory_space<vmem>>, %arg2: memref<84x128xbf16, #tpu.memory_space<vmem>>, %arg3: memref<1x128xf32, #tpu.memory_space<vmem>>, %arg4: memref<128x128xbf16, #tpu.memory_space<vmem>>, %arg5: memref<1x128xf32, #tpu.memory_space<vmem>>, %arg6: memref<128x128xbf16, #tpu.memory_space<vmem>>, %arg7: memref<1x128xf32, #tpu.memory_space<vmem>>, %arg8: memref<128x64xbf16, #tpu.memory_space<vmem>>, %arg9: memref<1x64xf32, #tpu.memory_space<vmem>>, %arg10: memref<64x4xbf16, #tpu.memory_space<vmem>>, %arg11: memref<1x4xf32, #tpu.memory_space<vmem>>, %arg12: memref<8x4xf32, #tpu.memory_space<vmem>>) attributes {dimension_semantics = [#tpu.dimension_semantics<parallel>], iteration_bounds = array<i64: 1>, scalar_prefetch = 0 : i64, scratch_operands = 0 : i64, tpu.core_type = #tpu.core_type<tc>, window_params = [{transform_indices = @transform_0, window_bounds = array<i64: 8, 84>}, {pipeline_mode = #tpu.pipeline_mode<synchronous>, transform_indices = @transform_1, window_bounds = array<i64: 84, 128>}, {pipeline_mode = #tpu.pipeline_mode<synchronous>, transform_indices = @transform_2, window_bounds = array<i64: 1, 128>}, {pipeline_mode = #tpu.pipeline_mode<synchronous>, transform_indices = @transform_3, window_bounds = array<i64: 128, 128>}, {pipeline_mode = #tpu.pipeline_mode<synchronous>, transform_indices = @transform_4, window_bounds = array<i64: 1, 128>}, {pipeline_mode = #tpu.pipeline_mode<synchronous>, transform_indices = @transform_5, window_bounds = array<i64: 128, 128>}, {pipeline_mode = #tpu.pipeline_mode<synchronous>, transform_indices = @transform_6, window_bounds = array<i64: 1, 128>}, {pipeline_mode = #tpu.pipeline_mode<synchronous>, transform_indices = @transform_7, window_bounds = array<i64: 128, 64>}, {pipeline_mode = #tpu.pipeline_mode<synchronous>, transform_indices = @transform_8, window_bounds = array<i64: 1, 64>}, {pipeline_mode = #tpu.pipeline_mode<synchronous>, transform_indices = @transform_9, window_bounds = array<i64: 64, 4>}, {pipeline_mode = #tpu.pipeline_mode<synchronous>, transform_indices = @transform_10, window_bounds = array<i64: 1, 4>}, {transform_indices = @transform_11, window_bounds = array<i64: 8, 4>}]} {
    %c0 = arith.constant 0 : index
    %c0_0 = arith.constant 0 : index
    %0 = vector.load %arg1[%c0, %c0_0] : memref<8x84xf32, #tpu.memory_space<vmem>>, vector<8x84xf32>
    %1 = arith.truncf %0 : vector<8x84xf32> to vector<8x84xbf16>
    %c0_1 = arith.constant 0 : index
    %c0_2 = arith.constant 0 : index
    %2 = vector.load %arg2[%c0_1, %c0_2] : memref<84x128xbf16, #tpu.memory_space<vmem>>, vector<84x128xbf16>
    %cst = arith.constant dense<0.000000e+00> : vector<8x128xf32>
    %3 = tpu.matmul %1, %2, %cst {dimension_numbers = #tpu.dot_dimension_numbers<[1], [0], [0], [1], [0, 0, 1, 1], [], []>} : vector<8x84xbf16>, vector<84x128xbf16>, vector<8x128xf32> -> vector<8x128xf32>
    %c0_3 = arith.constant 0 : index
    %c0_4 = arith.constant 0 : index
    %4 = vector.load %arg3[%c0_3, %c0_4] : memref<1x128xf32, #tpu.memory_space<vmem>>, vector<1x128xf32>
    %5 = vector.broadcast %4 : vector<1x128xf32> to vector<8x128xf32>
    %6 = arith.addf %3, %5 : vector<8x128xf32>
    %cst_5 = arith.constant 0.000000e+00 : f32
    %7 = vector.broadcast %cst_5 : f32 to vector<8x128xf32>
    %8 = arith.maximumf %6, %7 : vector<8x128xf32>
    %9 = arith.truncf %8 : vector<8x128xf32> to vector<8x128xbf16>
    %c0_6 = arith.constant 0 : index
    %c0_7 = arith.constant 0 : index
    %10 = vector.load %arg4[%c0_6, %c0_7] : memref<128x128xbf16, #tpu.memory_space<vmem>>, vector<128x128xbf16>
    %cst_8 = arith.constant dense<0.000000e+00> : vector<8x128xf32>
    %11 = tpu.matmul %9, %10, %cst_8 {dimension_numbers = #tpu.dot_dimension_numbers<[1], [0], [0], [1], [0, 0, 1, 1], [], []>} : vector<8x128xbf16>, vector<128x128xbf16>, vector<8x128xf32> -> vector<8x128xf32>
    %c0_9 = arith.constant 0 : index
    %c0_10 = arith.constant 0 : index
    %12 = vector.load %arg5[%c0_9, %c0_10] : memref<1x128xf32, #tpu.memory_space<vmem>>, vector<1x128xf32>
    %13 = vector.broadcast %12 : vector<1x128xf32> to vector<8x128xf32>
    %14 = arith.addf %11, %13 : vector<8x128xf32>
    %cst_11 = arith.constant 0.000000e+00 : f32
    %15 = vector.broadcast %cst_11 : f32 to vector<8x128xf32>
    %16 = arith.maximumf %14, %15 : vector<8x128xf32>
    %17 = arith.truncf %16 : vector<8x128xf32> to vector<8x128xbf16>
    %c0_12 = arith.constant 0 : index
    %c0_13 = arith.constant 0 : index
    %18 = vector.load %arg6[%c0_12, %c0_13] : memref<128x128xbf16, #tpu.memory_space<vmem>>, vector<128x128xbf16>
    %cst_14 = arith.constant dense<0.000000e+00> : vector<8x128xf32>
    %19 = tpu.matmul %17, %18, %cst_14 {dimension_numbers = #tpu.dot_dimension_numbers<[1], [0], [0], [1], [0, 0, 1, 1], [], []>} : vector<8x128xbf16>, vector<128x128xbf16>, vector<8x128xf32> -> vector<8x128xf32>
    %c0_15 = arith.constant 0 : index
    %c0_16 = arith.constant 0 : index
    %20 = vector.load %arg7[%c0_15, %c0_16] : memref<1x128xf32, #tpu.memory_space<vmem>>, vector<1x128xf32>
    %21 = vector.broadcast %20 : vector<1x128xf32> to vector<8x128xf32>
    %22 = arith.addf %19, %21 : vector<8x128xf32>
    %cst_17 = arith.constant 0.000000e+00 : f32
    %23 = vector.broadcast %cst_17 : f32 to vector<8x128xf32>
    %24 = arith.maximumf %22, %23 : vector<8x128xf32>
    %25 = arith.truncf %24 : vector<8x128xf32> to vector<8x128xbf16>
    %c0_18 = arith.constant 0 : index
    %c0_19 = arith.constant 0 : index
    %26 = vector.load %arg8[%c0_18, %c0_19] : memref<128x64xbf16, #tpu.memory_space<vmem>>, vector<128x64xbf16>
    %cst_20 = arith.constant dense<0.000000e+00> : vector<8x64xf32>
    %27 = tpu.matmul %25, %26, %cst_20 {dimension_numbers = #tpu.dot_dimension_numbers<[1], [0], [0], [1], [0, 0, 1, 1], [], []>} : vector<8x128xbf16>, vector<128x64xbf16>, vector<8x64xf32> -> vector<8x64xf32>
    %c0_21 = arith.constant 0 : index
    %c0_22 = arith.constant 0 : index
    %28 = vector.load %arg9[%c0_21, %c0_22] : memref<1x64xf32, #tpu.memory_space<vmem>>, vector<1x64xf32>
    %29 = vector.broadcast %28 : vector<1x64xf32> to vector<8x64xf32>
    %30 = arith.addf %27, %29 : vector<8x64xf32>
    %cst_23 = arith.constant 0.000000e+00 : f32
    %31 = vector.broadcast %cst_23 : f32 to vector<8x64xf32>
    %32 = arith.maximumf %30, %31 : vector<8x64xf32>
    %33 = arith.truncf %32 : vector<8x64xf32> to vector<8x64xbf16>
    %c0_24 = arith.constant 0 : index
    %c0_25 = arith.constant 0 : index
    %34 = vector.load %arg10[%c0_24, %c0_25] : memref<64x4xbf16, #tpu.memory_space<vmem>>, vector<64x4xbf16>
    %cst_26 = arith.constant dense<0.000000e+00> : vector<8x4xf32>
    %35 = tpu.matmul %33, %34, %cst_26 {dimension_numbers = #tpu.dot_dimension_numbers<[1], [0], [0], [1], [0, 0, 1, 1], [], []>} : vector<8x64xbf16>, vector<64x4xbf16>, vector<8x4xf32> -> vector<8x4xf32>
    %c0_27 = arith.constant 0 : index
    %c0_28 = arith.constant 0 : index
    %36 = vector.load %arg11[%c0_27, %c0_28] : memref<1x4xf32, #tpu.memory_space<vmem>>, vector<1x4xf32>
    %37 = vector.broadcast %36 : vector<1x4xf32> to vector<8x4xf32>
    %38 = arith.addf %35, %37 : vector<8x4xf32>
    %cst_29 = arith.constant dense<0xFF800000> : vector<8xf32>
    %39 = vector.multi_reduction <maximumf>, %38, %cst_29 [1] : vector<8x4xf32> to vector<8xf32>
    %40 = vector.shape_cast %39 : vector<8xf32> to vector<8x1xf32>
    %41 = vector.broadcast %40 : vector<8x1xf32> to vector<8x4xf32>
    %42 = arith.subf %38, %41 : vector<8x4xf32>
    %43 = math.exp %42 : vector<8x4xf32>
    %cst_30 = arith.constant dense<0.000000e+00> : vector<8xf32>
    %44 = vector.multi_reduction <add>, %43, %cst_30 [1] : vector<8x4xf32> to vector<8xf32>
    %45 = vector.shape_cast %44 : vector<8xf32> to vector<8x1xf32>
    %46 = vector.broadcast %45 : vector<8x1xf32> to vector<8x4xf32>
    %47 = arith.divf %43, %46 : vector<8x4xf32>
    %c0_31 = arith.constant 0 : index
    %c0_32 = arith.constant 0 : index
    %48 = vector.load %arg12[%c0_31, %c0_32] : memref<8x4xf32, #tpu.memory_space<vmem>>, vector<8x4xf32>
    tpu.vector_store %arg12[%c0_31, %c0_32], %47 {strides = array<i32>} : memref<8x4xf32, #tpu.memory_space<vmem>>, vector<8x4xf32>,
    return
  }
  func.func @transform_0(%arg0: i32) -> (i32, i32) {
    %c0_i32 = arith.constant 0 : i32
    %c0_i32_0 = arith.constant 0 : i32
    return %arg0, %c0_i32 : i32, i32
  }
  func.func @transform_1(%arg0: i32) -> (i32, i32) {
    %c0_i32 = arith.constant 0 : i32
    %c0_i32_0 = arith.constant 0 : i32
    %c0_i32_1 = arith.constant 0 : i32
    return %c0_i32, %c0_i32_0 : i32, i32
  }
  func.func @transform_2(%arg0: i32) -> (i32, i32) {
    %c0_i32 = arith.constant 0 : i32
    %c0_i32_0 = arith.constant 0 : i32
    %c0_i32_1 = arith.constant 0 : i32
    return %c0_i32, %c0_i32_0 : i32, i32
  }
  func.func @transform_3(%arg0: i32) -> (i32, i32) {
    %c0_i32 = arith.constant 0 : i32
    %c0_i32_0 = arith.constant 0 : i32
    %c0_i32_1 = arith.constant 0 : i32
    return %c0_i32, %c0_i32_0 : i32, i32
  }
  func.func @transform_4(%arg0: i32) -> (i32, i32) {
    %c0_i32 = arith.constant 0 : i32
    %c0_i32_0 = arith.constant 0 : i32
    %c0_i32_1 = arith.constant 0 : i32
    return %c0_i32, %c0_i32_0 : i32, i32
  }
  func.func @transform_5(%arg0: i32) -> (i32, i32) {
    %c0_i32 = arith.constant 0 : i32
    %c0_i32_0 = arith.constant 0 : i32
    %c0_i32_1 = arith.constant 0 : i32
    return %c0_i32, %c0_i32_0 : i32, i32
  }
  func.func @transform_6(%arg0: i32) -> (i32, i32) {
    %c0_i32 = arith.constant 0 : i32
    %c0_i32_0 = arith.constant 0 : i32
    %c0_i32_1 = arith.constant 0 : i32
    return %c0_i32, %c0_i32_0 : i32, i32
  }
  func.func @transform_7(%arg0: i32) -> (i32, i32) {
    %c0_i32 = arith.constant 0 : i32
    %c0_i32_0 = arith.constant 0 : i32
    %c0_i32_1 = arith.constant 0 : i32
    return %c0_i32, %c0_i32_0 : i32, i32
  }
  func.func @transform_8(%arg0: i32) -> (i32, i32) {
    %c0_i32 = arith.constant 0 : i32
    %c0_i32_0 = arith.constant 0 : i32
    %c0_i32_1 = arith.constant 0 : i32
    return %c0_i32, %c0_i32_0 : i32, i32
  }
  func.func @transform_9(%arg0: i32) -> (i32, i32) {
    %c0_i32 = arith.constant 0 : i32
    %c0_i32_0 = arith.constant 0 : i32
    %c0_i32_1 = arith.constant 0 : i32
    return %c0_i32, %c0_i32_0 : i32, i32
  }
  func.func @transform_10(%arg0: i32) -> (i32, i32) {
    %c0_i32 = arith.constant 0 : i32
    %c0_i32_0 = arith.constant 0 : i32
    %c0_i32_1 = arith.constant 0 : i32
    return %c0_i32, %c0_i32_0 : i32, i32
  }
  func.func @transform_11(%arg0: i32) -> (i32, i32) {
    %c0_i32 = arith.constant 0 : i32
    %c0_i32_0 = arith.constant 0 : i32
    return %arg0, %c0_i32 : i32, i32
  }
}

</mosaic_0001>

<bundles_post_ra>
// kernel: policy_forward.1
= control target key start
LH: loop header
LB: loop body
LE: loop exit
PB: predicated region body
PF: predicated region fallthrough
CT: control target
= control target key end

     0   :  { %16 = vsyncpa [#allocation3], 0  ;;  %s864_s0 = inlined_call_operand.vmem [shape: f32[8,84], index: 0, kind: input, shape index: {}]   ;;  %s865_s1 = inlined_call_operand.hbm [shape: bf16[84,128], index: 1, kind: input, shape index: {}]   ;;  %s866_s2 = inlined_call_operand.vmem [shape: f32[1,128], index: 2, kind: input, shape index: {}]   ;;  %s867_s3 = inlined_call_operand.vmem [shape: bf16[128,128], index: 3, kind: input, shape index: {}]   ;;  %s868_s4 = inlined_call_operand.vmem [shape: f32[1,128], index: 4, kind: input, shape index: {}]   ;;  %s869_s5 = inlined_call_operand.hbm [shape: bf16[128,128], index: 5, kind: input, shape index: {}]   ;;  %s870_s6 = inlined_call_operand.vmem [shape: f32[1,128], index: 6, kind: input, shape index: {}]   ;;  %s871_s7 = inlined_call_operand.vmem [shape: bf16[128,64], index: 7, kind: input, shape index: {}]   ;;  %s872_s8 = inlined_call_operand.vmem [shape: f32[1,64], index: 8, kind: input, shape index: {}]   ;;  %s873_s9 = inlined_call_operand.vmem [shape: bf16[64,4], index: 9, kind: input, shape index: {}]   ;;  %s874_s10 = inlined_call_operand.vmem [shape: f32[1,4], index: 10, kind: input, shape index: {}]   ;;  %s875_s11 = inlined_call_operand.vmem [shape: f32[8,4], index: 11, kind: output, shape index: {}]  }
   0x1   :  { %s24_s19 = sshll.u32 %s865_s1, 4  ;;  %s25_s19 = int_to_ptr.hbm [resolvable:$true] %s24_s19 }
   0x2   :  { %17 = vsyncpa [#allocation5], 0  ;;  %s710_s20 = smov [#allocation2]   ;;  %s43_s24 = sshll.u32 %s869_s5, 4  ;;  %s44_s24 = int_to_ptr.hbm [resolvable:$true] %s43_s24 }
   0x3   :  { %s26_s21 = sshll.u32 %s710_s20, 4  ;;  %s711_s25 = smov 64   ;;  %s27_s21 = int_to_ptr.vmem [resolvable:$true] %s26_s21 }
   0x4   :  { %s712_s26 = smov 4   ;;  %s713_s27 = smov [#allocation4]  }
   0x5   :  { %32 = dma.hbm_to_vmem [thread:$0]  %s25_s19, 704, %s27_s21, [#allocation3], %s711_s25, %s711_s25, %s712_s26  }
   0x6   :  { %s45_s28 = sshll.u32 %s713_s27, 4  ;;  %s46_s28 = int_to_ptr.vmem [resolvable:$true] %s45_s28 }
   0x7   :  { %51 = dma.hbm_to_vmem [thread:$0]  %s44_s24, 1024, %s46_s28, [#allocation5], %s711_s25, %s711_s25, %s712_s26  }
   0x8   :  { %706 = dma.done.wait [#allocation3], 704  }
   0x9   :  { %707 = vsyncadd [#allocation3], 4294966592 }
   0xa   :  { %708 = dma.done.wait [#allocation5], 1024  }
   0xb   :  { %709 = vsyncadd [#allocation5], 4294966272  ;;  %v83_v0 = vld [vmem:[#allocation2 + $0x28] sm:$0x3]  ;;  %vm125_vm0 = vcmask 1041408   ;;  %v624_v2 = vld [vmem:[%s867_s3 + $0x38] sm:$0xff] }
   0xc   :  { %v109_v1 = vunpack.c.l.b16 %v83_v0  ;;  %212 = vmatpush.bf16.msra.mxu1 %v624_v2  ;;  %v623_v4 = vld [vmem:[%s867_s3 + $0x30] sm:$0xff]  ;;  %v616_v6 = vld [vmem:[#allocation2 + $0x20] sm:$0xff]  ;;  %v622_v7 = vld [vmem:[%s867_s3 + $0x28] sm:$0xff]  ;;  %vm121_vm1 = vcmask 687104   ;;  %vm429_vm2 = vcmask 523264   ;;  %vm446_vm3 = vcmask 31744  }
   0xd   :  { %v615_v8 = vld [vmem:[#allocation2 + $0x18] sm:$0xff]  ;;  %v621_v9 = vld [vmem:[%s867_s3 + $0x20] sm:$0xff]  ;;  %v614_v10 = vld [vmem:[#allocation2 + $0x10] sm:$0xff] }
   0xe   :  { %v115_v3 = vpack.c.b16 %v109_v1, %v109_v1  ;;  %v620_v11 = vld [vmem:[%s867_s3 + $0x18] sm:$0xff]  ;;  %v613_v12 = vld [vmem:[#allocation2 + $0x8] sm:$0xff]  ;;  %v619_v13 = vld [vmem:[%s867_s3 + $0x10] sm:$0xff] }
   0xf   :  { %v612_v14 = vld [vmem:[#allocation2] sm:$0xff]  ;;  %v618_v17 = vld [vmem:[%s867_s3 + $0x8] sm:$0xff]  ;;  %v630_v21 = vld [vmem:[#allocation4 + $0x28] sm:$0xff] }
  0x10   :  { %v127_v5 = vsel %vm125_vm0, %v115_v3, 0  ;;  %213 = vmatpush.bf16.msra.mxu1 %v623_v4  ;;  %v71_v15 = vld [vmem:[%s864_s0] sm:$0xff]  ;;  %v629_v22 = vld [vmem:[#allocation4 + $0x20] sm:$0xff]  ;;  %v626_v31 = vld [vmem:[#allocation4 + $0x8] sm:$0xff] }
  0x11   :  { %131 = vmatpush.bf16.msra.mxu0 %v127_v5  ;;  %v72_v16 = vpack.c.bf16 %v71_v15, %v71_v15  ;;  %v617_v18 = vld [vmem:[%s867_s3] sm:$0xff]  ;;  %v625_v32 = vld [vmem:[#allocation4] sm:$0xff]  ;;  %v640_v33 = vld [vmem:[%s871_s7 + $0x38] sm:$0xff] }
  0x12   :  { %v632_v19 = vld [vmem:[#allocation4 + $0x38] sm:$0xff]  ;;  %v631_v20 = vld [vmem:[#allocation4 + $0x30] sm:$0xff]  ;;  %378 = vmatpush.bf16.msra.mxu3 %v640_v33  ;;  %v639_v34 = vld [vmem:[%s871_s7 + $0x30] sm:$0xff] }
  0x13   :  { %295 = vmatpush.bf16.msra.mxu2 %v632_v19  ;;  %v628_v23 = vld [vmem:[#allocation4 + $0x18] sm:$0xff]  ;;  %v627_v24 = vld [vmem:[#allocation4 + $0x10] sm:$0xff]  ;;  %v635_v38 = vld [vmem:[%s871_s7 + $0x10] sm:$0xff] }
  0x14   :  { %214 = vmatpush.bf16.msra.mxu1 %v622_v7  ;;  %v649_v25 = vld [vmem:[%s866_s2] ss:$0 sm:$0xff]  ;;  %v638_v35 = vld [vmem:[%s871_s7 + $0x28] sm:$0xff]  ;;  %v636_v37 = vld [vmem:[%s871_s7 + $0x18] sm:$0xff] }
  0x15   :  { %132 = vmatpush.bf16.msra.mxu0 %v616_v6  ;;  %v637_v36 = vld [vmem:[%s871_s7 + $0x20] sm:$0xff]  ;;  %v634_v45 = vld [vmem:[%s871_s7 + $0x8] sm:$0xff]  ;;  %v644_v47 = vld [vmem:[%s873_s9 + $0x18] sm:$0xff] }
  0x16   :  { %379 = vmatpush.bf16.msra.mxu3 %v639_v34  ;;  %v650_v39 = vld [vmem:[%s868_s4] ss:$0 sm:$0xff]  ;;  %v643_v48 = vld [vmem:[%s873_s9 + $0x10] sm:$0xff]  ;;  %v642_v49 = vld [vmem:[%s873_s9 + $0x8] sm:$0xff] }
  0x17   :  { %296 = vmatpush.bf16.msra.mxu2 %v631_v20  ;;  %v633_v46 = vld [vmem:[%s871_s7] sm:$0xff] }
  0x18   :  { %215 = vmatpush.bf16.msra.mxu1 %v621_v9  ;;  %v651_v50 = vld [vmem:[%s870_s6] ss:$0 sm:$0xff] }
  0x19   :  { %133 = vmatpush.bf16.msra.mxu0 %v615_v8  ;;  %v641_v56 = vld [vmem:[%s873_s9] sm:$0xff] }
  0x1a   :  { %380 = vmatpush.bf16.msra.mxu3 %v638_v35  ;;  %v652_v57 = vld [vmem:[%s872_s8] ss:$0 sm:$0xff] }
  0x1b   :  { %297 = vmatpush.bf16.msra.mxu2 %v630_v21  ;;  %v653_v63 = vld [vmem:[%s874_s10] ss:$0 sm:$0xff] }
  0x1c   :  { %216 = vmatpush.bf16.msra.mxu1 %v620_v11 }
  0x1d   :  { %134 = vmatpush.bf16.msra.mxu0 %v614_v10 }
  0x1e   :  { %381 = vmatpush.bf16.msra.mxu3 %v637_v36 }
  0x1f   :  { %298 = vmatpush.bf16.msra.mxu2 %v629_v22 }
  0x20   :  { %217 = vmatpush.bf16.msra.mxu1 %v619_v13 }
  0x21   :  { %135 = vmatpush.bf16.msra.mxu0 %v613_v12 }
  0x22   :  { %382 = vmatpush.bf16.msra.mxu3 %v636_v37 }
  0x23   :  { %299 = vmatpush.bf16.msra.mxu2 %v628_v23 }
  0x24   :  { %218 = vmatpush.bf16.msra.mxu1 %v618_v17 }
  0x25   :  { %136 = vmatpush.bf16.msra.mxu0 %v612_v14 }
  0x26   :  { %383 = vmatpush.bf16.msra.mxu3 %v635_v38 }
  0x27   :  { %300 = vmatpush.bf16.msra.mxu2 %v627_v24 }
  0x28   :  { %498 = vmatmul.msk.bf16.vlgmr.msra.gmra.mxu0 %vm121_vm1, %v72_v16  ;;  %219 = vmatpush.bf16.msra.mxu1 %v617_v18 }
  0x29   :  { %437 = vmatpush.bf16.msrb.mxu0 %v644_v47 }
  0x2a   :  { %384 = vmatpush.bf16.msra.mxu3 %v634_v45 }
  0x2b   :  { %301 = vmatpush.bf16.msra.mxu2 %v626_v31 }
  0x2d   :  { %438 = vmatpush.bf16.msrb.mxu0 %v643_v48 }
  0x2e   :  { %385 = vmatpush.bf16.msra.mxu3 %v633_v46 }
  0x2f   :  { %302 = vmatpush.bf16.msra.mxu2 %v625_v32 }
  0x31   :  { %439 = vmatpush.bf16.msrb.mxu0 %v642_v49 }
  0x35   :  { %440 = vmatpush.bf16.msrb.mxu0 %v641_v56 }
  0xa5   :  { %v138_v26 = vpop.f32.mrf.mxu0 }
  0xa6   :  { %v139_v27 = vadd.f32 %v649_v25, %v138_v26 }
  0xa8   :  { %v142_v28 = vmax.f32 %v139_v27, 0.0 }
  0xaa   :  { %v143_v29 = vpack.c.bf16 %v142_v28, %v142_v28 }
  0xac   :  { %220 = vmatmul.bf16.vlgmr.msra.gmra.mxu1 %v143_v29 }
  0xad   :  { %v140_v30 = vpop.f32.mrf.mxu0 }
 0x129   :  { %v221_v40 = vpop.f32.mrf.mxu1 }
 0x12a   :  { %v222_v41 = vadd.f32 %v650_v39, %v221_v40 }
 0x12c   :  { %v225_v42 = vmax.f32 %v222_v41, 0.0 }
 0x12e   :  { %v226_v43 = vpack.c.bf16 %v225_v42, %v225_v42 }
 0x130   :  { %303 = vmatmul.bf16.vlgmr.msra.gmra.mxu2 %v226_v43 }
 0x131   :  { %v223_v44 = vpop.f32.mrf.mxu1 }
 0x1b3   :  { %v304_v51 = vpop.f32.mrf.mxu2 }
 0x1b4   :  { %v305_v52 = vadd.f32 %v651_v50, %v304_v51 }
 0x1b6   :  { %v308_v53 = vmax.f32 %v305_v52, 0.0 }
 0x1b8   :  { %v309_v54 = vpack.c.bf16 %v308_v53, %v308_v53 }
 0x1ba   :  { %386 = vmatmul.bf16.vlgmr.msra.gmra.mxu3 %v309_v54 }
 0x1bb   :  { %v306_v55 = vpop.f32.mrf.mxu2 }
 0x23d   :  { %v387_v58 = vpop.f32.mrf.mxu3 }
 0x23e   :  { %v388_v59 = vadd.f32 %v652_v57, %v387_v58 }
 0x240   :  { %v391_v60 = vmax.f32 %v388_v59, 0.0 }
 0x242   :  { %v392_v61 = vpack.c.bf16 %v391_v60, %v391_v60 }
 0x244   :  { %611 = vmatmul.msk.bf16.vlgmr.msrb.gmra.mxu0 %vm429_vm2, %v392_v61 }
 0x245   :  { %v389_v62 = vpop.f32.mrf.mxu3 }
 0x2c1   :  { %v442_v0 = vpop.f32.mrf.mxu0 }
 0x2c2   :  { %v443_v1 = vadd.f32 %v653_v63, %v442_v0 }
 0x2c4   :  { %v447_v2 = vsel %vm446_vm3, %v443_v1, -inf }
 0x2c5   :  { %448 = vmax.xlane.f32.xlu0 %v447_v2 }
 0x2c9   :  { %v444_v3 = vpop.f32.mrf.mxu0 }
 0x338   :  { %v449_v4 = vpop.xlane.xlu0 %448 }
 0x339   :  { %v450_v5 = vsub.f32 %v443_v1, %v449_v4 }
 0x33b   :  { %v451_v6 = vmul.f32 1.442695, %v450_v5 }
 0x33d   :  { %654 = vpow2.f32 %v451_v6 }
 0x343   :  { %v655_v7 = vpop.eup %654 }
 0x344   :  { %v453_v8 = vsel %vm446_vm3, %v655_v7, 0.0 }
 0x345   :  { %454 = vadd.xlane.f32.xlu0 %v453_v8 }
 0x3b8   :  { %v455_v9 = vpop.xlane.xlu0 %454 }
 0x3b9   :  { %656 = vrcp.f32 %v455_v9  ;;  %v467_v13 = vand.u32 2147483648, %v455_v9  ;;  %v465_v15 = vand.u32 2147483647, %v455_v9  ;;  %vm461_vm5 = vweird.f32 %v455_v9 }
 0x3bb   :  { %v468_v17 = vor.u32 1.1754944e-38, %v467_v13  ;;  %vm466_vm7 = vcmp.eq.f32.partialorder %v465_v15, 8.507059e+37 }
 0x3bf   :  { %v657_v10 = vpop.eup %656 }
 0x3c0   :  { %v457_v11 = vmul.f32 %v657_v10, %v455_v9  ;;  %vm462_vm4 = vweird.f32 %v657_v10 }
 0x3c1   :  { %vm463_vm6 = vmor %vm461_vm5, %vm462_vm4 }
 0x3c2   :  { %v458_v12 = vsub.f32 1.0, %v457_v11 }
 0x3c4   :  { %v459_v14 = vmul.f32 %v657_v10, %v458_v12 }
 0x3c6   :  { %v460_v16 = vadd.f32 %v657_v10, %v459_v14 }
 0x3c8   :  { %v464_v18 = vsel %vm463_vm6, %v657_v10, %v460_v16 }
 0x3c9   :  { %v469_v19 = vsel %vm466_vm7, %v468_v17, %v464_v18 }
 0x3ca   :  { %v470_v20 = vmul.f32 %v655_v7, %v469_v19 }
 0x3cc   :  { %471 = vst.msk [vmem:[%s875_s11] sm:$0xff] %vm446_vm3, %v470_v20 }
 0x3cd   :  { %476 = vsyncpa [#allocation3], 1 }
 0x3ce   :  { %477 = vsyncpa [#allocation5], 1 }

</bundles_post_ra>
